<compile_context>
chip_gen: v5e
topology: v5e:2x2
jax: 0.10.0
libtpu: 0.0.40
codegen_flags: <defaults>
</compile_context>

<pallas_src>
import jax
import jax.numpy as jnp
from jax.experimental import pallas as pl
from jax.experimental.pallas import tpu as pltpu


def wrap_rnn_kernel(xs_ref, wt_ref, b_ref, out_ref):
    """Single-invocation kernel: whole sequence resident in VMEM.

    xs_ref : (T*3, 4)  all timesteps stacked along the sublane axis
    wt_ref : (4, 4)    pre-transposed Linear weight (so z = x @ wt == x @ W.T)
    b_ref  : (1, 4)    Linear bias
    out_ref: (3, 4)    relu(h_T)
    """
    T = xs_ref.shape[0] // 3  # static at trace time

    # ---- batched, time-independent precompute (off the serial critical path) ----
    # One MXU matmul for all T timesteps: Z = XS @ W.T + b, shape (T*3, 4).
    z = jnp.dot(xs_ref[...], wt_ref[...],
                preferred_element_type=jnp.float32) + b_ref[0]

    # Shared lane reduction for the decision gate: one row-sum over the whole
    # slab, then each timestep only needs a tiny (3,1) sublane reduce.
    row_sums = jnp.sum(z, axis=1, keepdims=True)          # (T*3, 1)

    # MyDecisionGate per timestep: g_t = z_t if sum(z_t) > 0 else -z_t.
    # Depends only on Z (not on h) -> scheduled ahead of / overlapped with the
    # serial tanh chain below.
    gs = []
    for t in range(T):                                    # static -> fully unrolled
        zt = z[3 * t:3 * (t + 1), :]                      # (3, 4), static slice
        st = jnp.sum(row_sums[3 * t:3 * (t + 1), :])      # scalar timestep sum
        gs.append(jnp.where(st > 0, zt, -zt))

    # ---- true recurrence: only add + tanh per step remains serial ----
    h = jnp.zeros((3, 4), jnp.float32)
    for t in range(T):                                    # static -> fully unrolled
        h = jnp.tanh(gs[t] + h)

    # WrapRNN: relu of the final hidden state.
    out_ref[...] = jnp.maximum(h, 0.0)


def wrap_rnn(xs, w, b):
    """xs: (T, 3, 4) f32, w: (4, 4) f32, b: (4,) f32 -> (3, 4) f32 (= relu(h_T))."""
    T = xs.shape[0]
    if T == 0:
        # Loop never runs: h stays zero, relu(0) == 0. Avoids zero-size kernel input.
        return jnp.zeros((3, 4), jnp.float32)

    xs2d = jnp.reshape(xs.astype(jnp.float32), (T * 3, 4))  # stack timesteps (sublane axis)
    wt = jnp.asarray(w, jnp.float32).T                       # pre-transpose once, outside kernel
    b2d = jnp.asarray(b, jnp.float32).reshape(1, 4)

    return pl.pallas_call(
        wrap_rnn_kernel,
        out_shape=jax.ShapeDtypeStruct((3, 4), jnp.float32),
        in_specs=[
            pl.BlockSpec(memory_space=pltpu.MemorySpace.VMEM),  # xs2d (T*3, 4) fully resident
            pl.BlockSpec(memory_space=pltpu.MemorySpace.VMEM),  # W^T  (4, 4)
            pl.BlockSpec(memory_space=pltpu.MemorySpace.VMEM),  # bias (1, 4)
        ],
        out_specs=pl.BlockSpec(memory_space=pltpu.MemorySpace.VMEM),
    )(xs2d, wt, b2d)


def wrap_rnn_ref(xs, w, b):
    """Pure-JAX reference for correctness checking."""
    h = jnp.zeros((3, 4), jnp.float32)
    for t in range(xs.shape[0]):
        z = xs[t] @ w.T + b
        g = jnp.where(jnp.sum(z) > 0, z, -z)
        h = jnp.tanh(g + h)
    return jnp.maximum(h, 0.0)


if __name__ == "__main__":
    key = jax.random.PRNGKey(0)
    k_xs, k_w, k_b = jax.random.split(key, 3)

    T = 8  # sequence length
    xs = jax.random.normal(k_xs, (T, 3, 4), dtype=jnp.float32)
    # Deterministic Linear(4, 4) parameters (synthetic, not a checkpoint load)
    w = jax.random.normal(k_w, (4, 4), dtype=jnp.float32) * 0.5
    b = jax.random.normal(k_b, (4,), dtype=jnp.float32) * 0.1

    fn = jax.jit(wrap_rnn)  # fuse wrapper-side reshape/transpose into one program
    out = jax.block_until_ready(fn(xs, w, b))
    ref = wrap_rnn_ref(xs, w, b)
    assert out.shape == (3, 4)
    assert jnp.allclose(out, ref, atol=1e-5, rtol=1e-5), (out, ref)

    print("KERNEL_OK")
</pallas_src>

<mosaic_0001>
module attributes {stable_mosaic.version = 11 : i64} {
  func.func @wrap_rnn_kernel(%arg0: memref<24x4xf32, #tpu.memory_space<vmem>>, %arg1: memref<4x4xf32, #tpu.memory_space<vmem>>, %arg2: memref<1x4xf32, #tpu.memory_space<vmem>>, %arg3: memref<3x4xf32, #tpu.memory_space<vmem>>) attributes {dimension_semantics = [], scalar_prefetch = 0 : i64, scratch_operands = 0 : i64, tpu.core_type = #tpu.core_type<tc>} {
    %c0 = arith.constant 0 : index
    %c0_0 = arith.constant 0 : index
    %0 = vector.load %arg0[%c0, %c0_0] : memref<24x4xf32, #tpu.memory_space<vmem>>, vector<24x4xf32>
    %c0_1 = arith.constant 0 : index
    %c0_2 = arith.constant 0 : index
    %1 = vector.load %arg1[%c0_1, %c0_2] : memref<4x4xf32, #tpu.memory_space<vmem>>, vector<4x4xf32>
    %cst = arith.constant dense<0.000000e+00> : vector<24x4xf32>
    %2 = tpu.matmul %0, %1, %cst {dimension_numbers = #tpu.dot_dimension_numbers<[1], [0], [0], [1], [0, 0, 1, 1], [], []>} : vector<24x4xf32>, vector<4x4xf32>, vector<24x4xf32> -> vector<24x4xf32>
    %c0_3 = arith.constant 0 : index
    %c0_4 = arith.constant 0 : index
    %3 = vector.load %arg2[%c0_3, %c0_4] : memref<1x4xf32, #tpu.memory_space<vmem>>, vector<1x4xf32>
    %4 = vector.shape_cast %3 : vector<1x4xf32> to vector<4xf32>
    %5 = vector.shape_cast %4 : vector<4xf32> to vector<1x4xf32>
    %6 = vector.broadcast %5 : vector<1x4xf32> to vector<24x4xf32>
    %7 = arith.addf %2, %6 : vector<24x4xf32>
    %cst_5 = arith.constant dense<0.000000e+00> : vector<24xf32>
    %8 = vector.multi_reduction <add>, %7, %cst_5 [1] : vector<24x4xf32> to vector<24xf32>
    %9 = vector.shape_cast %8 : vector<24xf32> to vector<24x1xf32>
    %10 = vector.extract_strided_slice %7 {offsets = [0, 0], sizes = [3, 4], strides = [1, 1]} : vector<24x4xf32> to vector<3x4xf32>
    %11 = vector.extract_strided_slice %9 {offsets = [0, 0], sizes = [3, 1], strides = [1, 1]} : vector<24x1xf32> to vector<3x1xf32>
    %12 = vector.shape_cast %11 : vector<3x1xf32> to vector<1x3x1xf32>
    %cst_6 = arith.constant dense<0.000000e+00> : vector<1xf32>
    %13 = vector.multi_reduction <add>, %12, %cst_6 [1, 2] : vector<1x3x1xf32> to vector<1xf32>
    %14 = vector.shape_cast %13 : vector<1xf32> to vector<1x1x1xf32>
    %15 = vector.extract %14[0, 0, 0] : f32 from vector<1x1x1xf32>
    %cst_7 = arith.constant 0.000000e+00 : f32
    %16 = arith.cmpf ogt, %15, %cst_7 : f32
    %cst_8 = arith.constant 0.000000e+00 : f32
    %17 = vector.broadcast %cst_8 : f32 to vector<3x4xf32>
    %18 = arith.subf %17, %10 : vector<3x4xf32>
    %19 = arith.select %16, %10, %18 : vector<3x4xf32>
    %20 = vector.extract_strided_slice %7 {offsets = [3, 0], sizes = [3, 4], strides = [1, 1]} : vector<24x4xf32> to vector<3x4xf32>
    %21 = vector.extract_strided_slice %9 {offsets = [3, 0], sizes = [3, 1], strides = [1, 1]} : vector<24x1xf32> to vector<3x1xf32>
    %22 = vector.shape_cast %21 : vector<3x1xf32> to vector<1x3x1xf32>
    %cst_9 = arith.constant dense<0.000000e+00> : vector<1xf32>
    %23 = vector.multi_reduction <add>, %22, %cst_9 [1, 2] : vector<1x3x1xf32> to vector<1xf32>
    %24 = vector.shape_cast %23 : vector<1xf32> to vector<1x1x1xf32>
    %25 = vector.extract %24[0, 0, 0] : f32 from vector<1x1x1xf32>
    %cst_10 = arith.constant 0.000000e+00 : f32
    %26 = arith.cmpf ogt, %25, %cst_10 : f32
    %cst_11 = arith.constant 0.000000e+00 : f32
    %27 = vector.broadcast %cst_11 : f32 to vector<3x4xf32>
    %28 = arith.subf %27, %20 : vector<3x4xf32>
    %29 = arith.select %26, %20, %28 : vector<3x4xf32>
    %30 = vector.extract_strided_slice %7 {offsets = [6, 0], sizes = [3, 4], strides = [1, 1]} : vector<24x4xf32> to vector<3x4xf32>
    %31 = vector.extract_strided_slice %9 {offsets = [6, 0], sizes = [3, 1], strides = [1, 1]} : vector<24x1xf32> to vector<3x1xf32>
    %32 = vector.shape_cast %31 : vector<3x1xf32> to vector<1x3x1xf32>
    %cst_12 = arith.constant dense<0.000000e+00> : vector<1xf32>
    %33 = vector.multi_reduction <add>, %32, %cst_12 [1, 2] : vector<1x3x1xf32> to vector<1xf32>
    %34 = vector.shape_cast %33 : vector<1xf32> to vector<1x1x1xf32>
    %35 = vector.extract %34[0, 0, 0] : f32 from vector<1x1x1xf32>
    %cst_13 = arith.constant 0.000000e+00 : f32
    %36 = arith.cmpf ogt, %35, %cst_13 : f32
    %cst_14 = arith.constant 0.000000e+00 : f32
    %37 = vector.broadcast %cst_14 : f32 to vector<3x4xf32>
    %38 = arith.subf %37, %30 : vector<3x4xf32>
    %39 = arith.select %36, %30, %38 : vector<3x4xf32>
    %40 = vector.extract_strided_slice %7 {offsets = [9, 0], sizes = [3, 4], strides = [1, 1]} : vector<24x4xf32> to vector<3x4xf32>
    %41 = vector.extract_strided_slice %9 {offsets = [9, 0], sizes = [3, 1], strides = [1, 1]} : vector<24x1xf32> to vector<3x1xf32>
    %42 = vector.shape_cast %41 : vector<3x1xf32> to vector<1x3x1xf32>
    %cst_15 = arith.constant dense<0.000000e+00> : vector<1xf32>
    %43 = vector.multi_reduction <add>, %42, %cst_15 [1, 2] : vector<1x3x1xf32> to vector<1xf32>
    %44 = vector.shape_cast %43 : vector<1xf32> to vector<1x1x1xf32>
    %45 = vector.extract %44[0, 0, 0] : f32 from vector<1x1x1xf32>
    %cst_16 = arith.constant 0.000000e+00 : f32
    %46 = arith.cmpf ogt, %45, %cst_16 : f32
    %cst_17 = arith.constant 0.000000e+00 : f32
    %47 = vector.broadcast %cst_17 : f32 to vector<3x4xf32>
    %48 = arith.subf %47, %40 : vector<3x4xf32>
    %49 = arith.select %46, %40, %48 : vector<3x4xf32>
    %50 = vector.extract_strided_slice %7 {offsets = [12, 0], sizes = [3, 4], strides = [1, 1]} : vector<24x4xf32> to vector<3x4xf32>
    %51 = vector.extract_strided_slice %9 {offsets = [12, 0], sizes = [3, 1], strides = [1, 1]} : vector<24x1xf32> to vector<3x1xf32>
    %52 = vector.shape_cast %51 : vector<3x1xf32> to vector<1x3x1xf32>
    %cst_18 = arith.constant dense<0.000000e+00> : vector<1xf32>
    %53 = vector.multi_reduction <add>, %52, %cst_18 [1, 2] : vector<1x3x1xf32> to vector<1xf32>
    %54 = vector.shape_cast %53 : vector<1xf32> to vector<1x1x1xf32>
    %55 = vector.extract %54[0, 0, 0] : f32 from vector<1x1x1xf32>
    %cst_19 = arith.constant 0.000000e+00 : f32
    %56 = arith.cmpf ogt, %55, %cst_19 : f32
    %cst_20 = arith.constant 0.000000e+00 : f32
    %57 = vector.broadcast %cst_20 : f32 to vector<3x4xf32>
    %58 = arith.subf %57, %50 : vector<3x4xf32>
    %59 = arith.select %56, %50, %58 : vector<3x4xf32>
    %60 = vector.extract_strided_slice %7 {offsets = [15, 0], sizes = [3, 4], strides = [1, 1]} : vector<24x4xf32> to vector<3x4xf32>
    %61 = vector.extract_strided_slice %9 {offsets = [15, 0], sizes = [3, 1], strides = [1, 1]} : vector<24x1xf32> to vector<3x1xf32>
    %62 = vector.shape_cast %61 : vector<3x1xf32> to vector<1x3x1xf32>
    %cst_21 = arith.constant dense<0.000000e+00> : vector<1xf32>
    %63 = vector.multi_reduction <add>, %62, %cst_21 [1, 2] : vector<1x3x1xf32> to vector<1xf32>
    %64 = vector.shape_cast %63 : vector<1xf32> to vector<1x1x1xf32>
    %65 = vector.extract %64[0, 0, 0] : f32 from vector<1x1x1xf32>
    %cst_22 = arith.constant 0.000000e+00 : f32
    %66 = arith.cmpf ogt, %65, %cst_22 : f32
    %cst_23 = arith.constant 0.000000e+00 : f32
    %67 = vector.broadcast %cst_23 : f32 to vector<3x4xf32>
    %68 = arith.subf %67, %60 : vector<3x4xf32>
    %69 = arith.select %66, %60, %68 : vector<3x4xf32>
    %70 = vector.extract_strided_slice %7 {offsets = [18, 0], sizes = [3, 4], strides = [1, 1]} : vector<24x4xf32> to vector<3x4xf32>
    %71 = vector.extract_strided_slice %9 {offsets = [18, 0], sizes = [3, 1], strides = [1, 1]} : vector<24x1xf32> to vector<3x1xf32>
    %72 = vector.shape_cast %71 : vector<3x1xf32> to vector<1x3x1xf32>
    %cst_24 = arith.constant dense<0.000000e+00> : vector<1xf32>
    %73 = vector.multi_reduction <add>, %72, %cst_24 [1, 2] : vector<1x3x1xf32> to vector<1xf32>
    %74 = vector.shape_cast %73 : vector<1xf32> to vector<1x1x1xf32>
    %75 = vector.extract %74[0, 0, 0] : f32 from vector<1x1x1xf32>
    %cst_25 = arith.constant 0.000000e+00 : f32
    %76 = arith.cmpf ogt, %75, %cst_25 : f32
    %cst_26 = arith.constant 0.000000e+00 : f32
    %77 = vector.broadcast %cst_26 : f32 to vector<3x4xf32>
    %78 = arith.subf %77, %70 : vector<3x4xf32>
    %79 = arith.select %76, %70, %78 : vector<3x4xf32>
    %80 = vector.extract_strided_slice %7 {offsets = [21, 0], sizes = [3, 4], strides = [1, 1]} : vector<24x4xf32> to vector<3x4xf32>
    %81 = vector.extract_strided_slice %9 {offsets = [21, 0], sizes = [3, 1], strides = [1, 1]} : vector<24x1xf32> to vector<3x1xf32>
    %82 = vector.shape_cast %81 : vector<3x1xf32> to vector<1x3x1xf32>
    %cst_27 = arith.constant dense<0.000000e+00> : vector<1xf32>
    %83 = vector.multi_reduction <add>, %82, %cst_27 [1, 2] : vector<1x3x1xf32> to vector<1xf32>
    %84 = vector.shape_cast %83 : vector<1xf32> to vector<1x1x1xf32>
    %85 = vector.extract %84[0, 0, 0] : f32 from vector<1x1x1xf32>
    %cst_28 = arith.constant 0.000000e+00 : f32
    %86 = arith.cmpf ogt, %85, %cst_28 : f32
    %cst_29 = arith.constant 0.000000e+00 : f32
    %87 = vector.broadcast %cst_29 : f32 to vector<3x4xf32>
    %88 = arith.subf %87, %80 : vector<3x4xf32>
    %89 = arith.select %86, %80, %88 : vector<3x4xf32>
    %cst_30 = arith.constant 0.000000e+00 : f32
    %90 = vector.broadcast %cst_30 : f32 to vector<3x4xf32>
    %91 = arith.addf %19, %90 : vector<3x4xf32>
    %92 = math.tanh %91 : vector<3x4xf32>
    %93 = arith.addf %29, %92 : vector<3x4xf32>
    %94 = math.tanh %93 : vector<3x4xf32>
    %95 = arith.addf %39, %94 : vector<3x4xf32>
    %96 = math.tanh %95 : vector<3x4xf32>
    %97 = arith.addf %49, %96 : vector<3x4xf32>
    %98 = math.tanh %97 : vector<3x4xf32>
    %99 = arith.addf %59, %98 : vector<3x4xf32>
    %100 = math.tanh %99 : vector<3x4xf32>
    %101 = arith.addf %69, %100 : vector<3x4xf32>
    %102 = math.tanh %101 : vector<3x4xf32>
    %103 = arith.addf %79, %102 : vector<3x4xf32>
    %104 = math.tanh %103 : vector<3x4xf32>
    %105 = arith.addf %89, %104 : vector<3x4xf32>
    %106 = math.tanh %105 : vector<3x4xf32>
    %cst_31 = arith.constant 0.000000e+00 : f32
    %107 = vector.broadcast %cst_31 : f32 to vector<3x4xf32>
    %108 = arith.maximumf %106, %107 : vector<3x4xf32>
    %c0_32 = arith.constant 0 : index
    %c0_33 = arith.constant 0 : index
    %109 = vector.load %arg3[%c0_32, %c0_33] : memref<3x4xf32, #tpu.memory_space<vmem>>, vector<3x4xf32>
    tpu.vector_store %arg3[%c0_32, %c0_33], %108 {strides = array<i32>} : memref<3x4xf32, #tpu.memory_space<vmem>>, vector<3x4xf32>,
    return
  }
}

</mosaic_0001>

<bundles_post_ra>
// kernel: wrap_rnn.1
= control target key start
LH: loop header
LB: loop body
LE: loop exit
PB: predicated region body
PF: predicated region fallthrough
CT: control target
= control target key end

     0   :  { %vm33_vm0 = vcmask 1043456   ;;  %vm23_vm1 = vcmask 31744   ;;  %s435_s0 = inlined_call_operand.vmem [shape: f32[24,4], index: 0, kind: input, shape index: {}]   ;;  %s436_s1 = inlined_call_operand.vmem [shape: f32[4,4], index: 1, kind: input, shape index: {}]   ;;  %s437_s2 = inlined_call_operand.vmem [shape: f32[1,4], index: 2, kind: input, shape index: {}]   ;;  %s438_s3 = inlined_call_operand.hbm [shape: f32[3,4], index: 3, kind: output, shape index: {}]  }
   0x1   :  { %v18_v0 = vld [vmem:[%s436_s1] sm:$0xf]  ;;  %v16_v2 = vld [vmem:[%s435_s0 + $0x8] sm:$0xff]  ;;  %v17_v3 = vld [vmem:[%s435_s0 + $0x10] sm:$0xff] }
   0x2   :  { %v15_v1 = vld [vmem:[%s435_s0] sm:$0xff]  ;;  %288 = vmatpush.msk.msra.mxu0 %vm33_vm0, %v18_v0  ;;  %292 = vmatpush.msk.msra.mxu1 %vm33_vm0, %v18_v0 }
   0x3   :  { %289 = vmatmul.msk.f32.vlgmr.msra.gmra.mxu0 %vm23_vm1, %v15_v1  ;;  %290 = vmatmul.msk.f32.vlgmr.msra.gmra.mxu1 %vm23_vm1, %v16_v2 }
   0x4   :  { %8 = vsyncpa [#allocation3], 0  ;;  %293 = vmatpush.msk.msra.mxu2 %vm33_vm0, %v18_v0  ;;  %v311_v4 = vld [vmem:[%s437_s2] ss:$0 sm:$0xff]  ;;  %vm72_vm2 = vcmask 2048   ;;  %vm108_vm3 = vcmask 1041408  }
   0x5   :  { %291 = vmatmul.msk.f32.vlgmr.msra.gmra.mxu2 %vm23_vm1, %v17_v3  ;;  %vm165_vm4 = vcmask 1040384   ;;  %vm237_vm9 = vcmask 1042432   ;;  %s358_s8 = smov [#allocation2]   ;;  %s279_s12 = sshll.u32 %s438_s3, 4  ;;  %vm270_vm14 = vcmask 31749   ;;  %s280_s12 = int_to_ptr.hbm [resolvable:$true] %s279_s12 }
   0x6   :  { %s277_s9 = sshll.u32 %s358_s8, 4  ;;  %s278_s9 = int_to_ptr.vmem [resolvable:$true] %s277_s9 }
  0x80   :  { %v54_v5 = vpop.f32.mrf.mxu0  ;;  %v57_v7 = vpop.f32.mrf.mxu1 }
  0x81   :  { %v397_v6 = vadd.f32 %v311_v4, %v54_v5  ;;  %v401_v9 = vadd.f32 %v311_v4, %v57_v7 }
  0x83   :  { %v63_v8 = vsel %vm23_vm1, %v397_v6, 0.0  ;;  %v66_v11 = vsel %vm23_vm1, %v401_v9, 0.0 }
  0x84   :  { %64 = vadd.xlane.f32.xlu0 %v63_v8 }
  0x88   :  { %v60_v10 = vpop.f32.mrf.mxu2 }
  0x89   :  { %v405_v12 = vadd.f32 %v311_v4, %v60_v10 }
  0x8b   :  { %v69_v13 = vsel %vm23_vm1, %v405_v12, 0.0 }
  0x8c   :  { %67 = vadd.xlane.f32.xlu0 %v66_v11  ;;  %70 = vadd.xlane.f32.xlu2 %v69_v13 }
  0xf7   :  { %v65_v14 = vpop.xlane.xlu0 %64 }
  0xf8   :  { %v73_v15 = vsel %vm72_vm2, %v65_v14, 0.0  ;;  %v90_v16 = vrot.slane %v65_v14, 3  ;;  %v109_v19 = vrot.slane %v65_v14, 6 }
  0xf9   :  { %74 = vadd.xlane.f32.xlu1 %v73_v15 }
  0xfa   :  { %v92_v21 = vsel %vm72_vm2, %v90_v16, 0.0 }
  0xff   :  { %v68_v17 = vpop.xlane.xlu0 %67  ;;  %v71_v18 = vpop.xlane.xlu2 %70 }
 0x100   :  { %v110_v20 = vrot.slane %v68_v17, 6  ;;  %v130_v22 = vrot.slane %v68_v17, 1  ;;  %v166_v23 = vrot.slane %v68_v17, 7  ;;  %v167_v26 = vrot.slane %v71_v18, 7 }
 0x101   :  { %93 = vadd.xlane.f32.xlu1 %v92_v21  ;;  %v147_v27 = vrot.slane %v68_v17, 4  ;;  %v187_v29 = vrot.slane %v71_v18, 2  ;;  %v204_v34 = vrot.slane %v71_v18, 5 }
 0x102   :  { %v132_v24 = vsel %vm72_vm2, %v130_v22, 0.0  ;;  %v111_v25 = vsel %vm108_vm3, %v109_v19, %v110_v20  ;;  %v168_v31 = vsel %vm165_vm4, %v166_v23, %v167_v26 }
 0x103   :  { %133 = vadd.xlane.f32.xlu0 %v132_v24  ;;  %v113_v28 = vsel %vm72_vm2, %v111_v25, 0.0  ;;  %v149_v30 = vsel %vm72_vm2, %v147_v27, 0.0  ;;  %v189_v32 = vsel %vm72_vm2, %v187_v29, 0.0  ;;  %v170_v33 = vsel %vm72_vm2, %v168_v31, 0.0 }
 0x104   :  { %114 = vadd.xlane.f32.xlu2 %v113_v28  ;;  %v206_v35 = vsel %vm72_vm2, %v204_v34, 0.0  ;;  %v84_v31 = vsub.f32 0.0, %v397_v6 }
 0x109   :  { %150 = vadd.xlane.f32.xlu1 %v149_v30 }
 0x10b   :  { %190 = vadd.xlane.f32.xlu0 %v189_v32 }
 0x10c   :  { %171 = vadd.xlane.f32.xlu2 %v170_v33 }
 0x111   :  { %207 = vadd.xlane.f32.xlu1 %v206_v35 }
 0x16c   :  { %v75_v36 = vpop.xlane.xlu1 %74 }
 0x16d   :  { %v76_v37 = vrot.slane %v75_v36, 4 }
 0x16f   :  { %v77_v38 = vadd.f32 %v76_v37, %v75_v36 }
 0x171   :  { %v78_v39 = vrot.slane %v77_v38, 2 }
 0x173   :  { %v79_v40 = vadd.f32 %v78_v39, %v77_v38 }
 0x174   :  { %v94_v41 = vpop.xlane.xlu1 %93 }
 0x175   :  { %v95_v42 = vrot.slane %v94_v41, 4  ;;  %v80_v43 = vrot.slane %v79_v40, 1 }
 0x176   :  { %v134_v44 = vpop.xlane.xlu0 %133 }
 0x177   :  { %v96_v45 = vadd.f32 %v95_v42, %v94_v41  ;;  %v135_v46 = vrot.slane %v134_v44, 4  ;;  %v115_v47 = vpop.xlane.xlu2 %114  ;;  %v81_v48 = vadd.f32 %v80_v43, %v79_v40  ;;  %v124_v41 = vsub.f32 0.0, %v401_v9 }
 0x178   :  { %v116_v49 = vrot.slane %v115_v47, 4 }
 0x179   :  { %v97_v50 = vrot.slane %v96_v45, 2  ;;  %v136_v51 = vadd.f32 %v135_v46, %v134_v44  ;;  %294 = vpush %v81_v48 }
 0x17a   :  { %v117_v52 = vadd.f32 %v116_v49, %v115_v47 }
 0x17b   :  { %v137_v53 = vrot.slane %v136_v51, 2  ;;  %v98_v54 = vadd.f32 %v97_v50, %v96_v45 }
 0x17c   :  { %v118_v55 = vrot.slane %v117_v52, 2  ;;  %v151_v56 = vpop.xlane.xlu1 %150 }
 0x17d   :  { %v152_v57 = vrot.slane %v151_v56, 4  ;;  %v99_v58 = vrot.slane %v98_v54, 1  ;;  %v138_v59 = vadd.f32 %v137_v53, %v136_v51 }
 0x17e   :  { %v191_v60 = vpop.xlane.xlu0 %190  ;;  %v119_v61 = vadd.f32 %v118_v55, %v117_v52 }
 0x17f   :  { %v153_v62 = vadd.f32 %v152_v57, %v151_v56  ;;  %v192_v63 = vrot.slane %v191_v60, 4  ;;  %v172_v0 = vpop.xlane.xlu2 %171  ;;  %v100_v1 = vadd.f32 %v99_v58, %v98_v54  ;;  %v139_v2 = vrot.slane %v138_v59, 1 }
 0x180   :  { %v173_v3 = vrot.slane %v172_v0, 4  ;;  %v120_v4 = vrot.slane %v119_v61, 1 }
 0x181   :  { %v154_v5 = vrot.slane %v153_v62, 2  ;;  %v193_v7 = vadd.f32 %v192_v63, %v191_v60  ;;  %296 = vpush %v100_v1  ;;  %v140_v8 = vadd.f32 %v139_v2, %v138_v59 }
 0x182   :  { %v174_v10 = vadd.f32 %v173_v3, %v172_v0  ;;  %v121_v11 = vadd.f32 %v120_v4, %v119_v61  ;;  %v181_v61 = vsub.f32 0.0, %v405_v12 }
 0x183   :  { %v194_v13 = vrot.slane %v193_v7, 2  ;;  %v155_v14 = vadd.f32 %v154_v5, %v153_v62 }
 0x184   :  { %v175_v15 = vrot.slane %v174_v10, 2  ;;  %v208_v16 = vpop.xlane.xlu1 %207  ;;  %298 = vpush %v121_v11 }
 0x185   :  { %v195_v17 = vadd.f32 %v194_v13, %v193_v7  ;;  %v209_v18 = vrot.slane %v208_v16, 4  ;;  %300 = vpush %v140_v8  ;;  %v156_v19 = vrot.slane %v155_v14, 1 }
 0x186   :  { %v176_v20 = vadd.f32 %v175_v15, %v174_v10 }
 0x187   :  { %v210_v21 = vadd.f32 %v209_v18, %v208_v16  ;;  %v157_v22 = vadd.f32 %v156_v19, %v155_v14  ;;  %v196_v23 = vrot.slane %v195_v17, 1 }
 0x188   :  { %v177_v24 = vrot.slane %v176_v20, 1 }
 0x189   :  { %v211_v25 = vrot.slane %v210_v21, 2  ;;  %302 = vpush %v157_v22  ;;  %v197_v26 = vadd.f32 %v196_v23, %v195_v17 }
 0x18a   :  { %v178_v27 = vadd.f32 %v177_v24, %v176_v20 }
 0x18b   :  { %v212_v28 = vadd.f32 %v211_v25, %v210_v21 }
 0x18c   :  { %304 = vpush %v178_v27 }
 0x18d   :  { %306 = vpush %v197_v26  ;;  %v213_v29 = vrot.slane %v212_v28, 1 }
 0x18f   :  { %v214_v30 = vadd.f32 %v213_v29, %v212_v28 }
 0x191   :  { %308 = vpush %v214_v30 }
 0x1aa   :  { %s295_s0 = spop %294 }
 0x1ab   :  { %p83_p0 = scmp.gt.f32.partialorder %s295_s0, 0.0 }
 0x1ad   :  { %s85_s2 = scalar_select %p83_p0, 1, 0 }
 0x1af   :  { %v86_v32 = vstv %s85_s2 }
 0x1b0   :  { %vm87_vm5 = vcmp.eq.s32.totalorder %v86_v32, 1 }
 0x1b1   :  { %v88_v33 = vsel %vm87_vm5, %v397_v6, %v84_v31 }
 0x1b2   :  { %312 = vtanh.f32 %v88_v33  ;;  %s297_s21 = spop %296 }
 0x1b3   :  { %p102_p1 = scmp.gt.f32.partialorder %s297_s21, 0.0 }
 0x1b5   :  { %s103_s22 = scalar_select %p102_p1, 1, 0 }
 0x1b6   :  { %s299_s23 = spop %298 }
 0x1b7   :  { %v104_v34 = vstv %s103_s22  ;;  %p123_p2 = scmp.gt.f32.partialorder %s299_s23, 0.0  ;;  %s301_s25 = spop %300 }
 0x1b8   :  { %v313_v35 = vpop.eup %312  ;;  %vm105_vm6 = vcmp.eq.s32.totalorder %v104_v34, 1  ;;  %p142_p3 = scmp.gt.f32.partialorder %s301_s25, 0.0 }
 0x1b9   :  { %v224_v36 = vrot.slane %v313_v35, 5  ;;  %v106_v37 = vsel %vm105_vm6, %v397_v6, %v84_v31  ;;  %s125_s24 = scalar_select %p123_p2, 1, 0 }
 0x1ba   :  { %s143_s26 = scalar_select %p142_p3, 1, 0 }
 0x1bb   :  { %v226_v38 = vadd.f32 %v224_v36, %v106_v37  ;;  %v126_v39 = vstv %s125_s24  ;;  %s303_s27 = spop %302 }
 0x1bc   :  { %vm127_vm7 = vcmp.eq.s32.totalorder %v126_v39, 1  ;;  %v144_v47 = vstv %s143_s26  ;;  %p159_p4 = scmp.gt.f32.partialorder %s303_s27, 0.0 }
 0x1bd   :  { %314 = vtanh.f32 %v226_v38  ;;  %v128_v43 = vsel %vm127_vm7, %v397_v6, %v84_v31  ;;  %v129_v44 = vsel %vm127_vm7, %v401_v9, %v124_v41  ;;  %vm145_vm8 = vcmp.eq.s32.totalorder %v144_v47, 1  ;;  %s305_s29 = spop %304 }
 0x1be   :  { %v146_v52 = vsel %vm145_vm8, %v401_v9, %v124_v41  ;;  %s160_s28 = scalar_select %p159_p4, 1, 0 }
 0x1bf   :  { %p180_p5 = scmp.gt.f32.partialorder %s305_s29, 0.0  ;;  %s307_s4 = spop %306 }
 0x1c0   :  { %v161_v54 = vstv %s160_s28  ;;  %p199_p6 = scmp.gt.f32.partialorder %s307_s4, 0.0 }
 0x1c1   :  { %vm162_vm10 = vcmp.eq.s32.totalorder %v161_v54, 1  ;;  %s182_s30 = scalar_select %p180_p5, 1, 0 }
 0x1c2   :  { %v163_v57 = vsel %vm162_vm10, %v401_v9, %v124_v41  ;;  %s200_s5 = scalar_select %p199_p6, 1, 0 }
 0x1c3   :  { %v315_v40 = vpop.eup %314  ;;  %v183_v59 = vstv %s182_s30  ;;  %s309_s6 = spop %308 }
 0x1c4   :  { %v229_v42 = vrot.slane %v315_v40, 5  ;;  %vm184_vm11 = vcmp.eq.s32.totalorder %v183_v59, 1  ;;  %v201_v3 = vstv %s200_s5  ;;  %p216_p7 = scmp.gt.f32.partialorder %s309_s6, 0.0 }
 0x1c5   :  { %v185_v63 = vsel %vm184_vm11, %v401_v9, %v124_v41  ;;  %v186_v0 = vsel %vm184_vm11, %v405_v12, %v181_v61  ;;  %vm202_vm12 = vcmp.eq.s32.totalorder %v201_v3, 1 }
 0x1c6   :  { %v231_v45 = vadd.f32 %v229_v42, %v128_v43  ;;  %v232_v46 = vadd.f32 %v229_v42, %v129_v44  ;;  %v203_v10 = vsel %vm202_vm12, %v405_v12, %v181_v61  ;;  %s217_s7 = scalar_select %p216_p7, 1, 0 }
 0x1c8   :  { %316 = vtanh.f32 %v231_v45  ;;  %v218_v13 = vstv %s217_s7 }
 0x1c9   :  { %318 = vtanh.f32 %v232_v46  ;;  %vm219_vm13 = vcmp.eq.s32.totalorder %v218_v13, 1 }
 0x1ca   :  { %v220_v16 = vsel %vm219_vm13, %v405_v12, %v181_v61 }
 0x1ce   :  { %v317_v48 = vpop.eup %316 }
 0x1cf   :  { %v319_v49 = vpop.eup %318  ;;  %v238_v50 = vrot.slane %v317_v48, 5 }
 0x1d0   :  { %v239_v51 = vrot.slane %v319_v49, 5 }
 0x1d2   :  { %v240_v6 = vsel %vm237_vm9, %v238_v50, %v239_v51 }
 0x1d3   :  { %v242_v53 = vadd.f32 %v240_v6, %v146_v52 }
 0x1d5   :  { %320 = vtanh.f32 %v242_v53 }
 0x1db   :  { %v321_v55 = vpop.eup %320 }
 0x1dc   :  { %v245_v56 = vrot.slane %v321_v55, 5 }
 0x1de   :  { %v247_v58 = vadd.f32 %v245_v56, %v163_v57 }
 0x1e0   :  { %322 = vtanh.f32 %v247_v58 }
 0x1e6   :  { %v323_v60 = vpop.eup %322 }
 0x1e7   :  { %v250_v62 = vrot.slane %v323_v60, 5 }
 0x1e9   :  { %v252_v1 = vadd.f32 %v250_v62, %v185_v63  ;;  %v253_v2 = vadd.f32 %v250_v62, %v186_v0 }
 0x1eb   :  { %324 = vtanh.f32 %v252_v1 }
 0x1ec   :  { %326 = vtanh.f32 %v253_v2 }
 0x1f1   :  { %v325_v4 = vpop.eup %324 }
 0x1f2   :  { %v327_v5 = vpop.eup %326  ;;  %v258_v7 = vrot.slane %v325_v4, 5 }
 0x1f3   :  { %v259_v8 = vrot.slane %v327_v5, 5 }
 0x1f5   :  { %v260_v11 = vsel %vm237_vm9, %v258_v7, %v259_v8 }
 0x1f6   :  { %v262_v9 = vadd.f32 %v260_v11, %v203_v10 }
 0x1f8   :  { %328 = vtanh.f32 %v262_v9 }
 0x1fe   :  { %v329_v14 = vpop.eup %328 }
 0x1ff   :  { %v265_v15 = vrot.slane %v329_v14, 5 }
 0x201   :  { %v267_v17 = vadd.f32 %v265_v15, %v220_v16 }
 0x203   :  { %330 = vtanh.f32 %v267_v17 }
 0x209   :  { %v331_v18 = vpop.eup %330 }
 0x20a   :  { %v269_v19 = vmax.f32 %v331_v18, 0.0 }
 0x20c   :  { %271 = vst.msk [vmem:[#allocation2 - $0x5] sm:$0xe0] %vm270_vm14, %v269_v19 }
 0x20d   :  { %282 = dma.vmem_to_hbm [thread:$0]  %s278_s9, 64, %s280_s12, [#allocation3]  }
 0x20e   :  { %356 = dma.done.wait [#allocation3], 64  }
 0x20f   :  { %357 = vsyncadd [#allocation3], 4294967232 }
 0x210   :  { %287 = vsyncpa [#allocation3], 1 }

</bundles_post_ra>
